<compile_context>
chip_gen: v6e
topology: v6e:2x2x1
jax: 0.10.0
libtpu: 0.0.40
codegen_flags: <defaults>
</compile_context>

<pallas_src>
import functools

import jax
import jax.numpy as jnp
from jax.experimental import pallas as pl
from jax.experimental.pallas import tpu as pltpu


def _round_up(x, m):
    return (x + m - 1) // m * m


def _conv_bn_relu_kernel(x_ref, w_ref, b_ref, o_ref):
    # x_ref: (1, TM, KKCp)   im2col rows for one spatial tile of one image
    # w_ref: (KKCp, COp)     BN-scale-folded conv weights
    # b_ref: (1, COp)        fused additive shift (conv bias + BN shift)
    # o_ref: (1, TM, COp)    lane-dense output tile
    acc = jnp.dot(x_ref[0], w_ref[...], preferred_element_type=jnp.float32)
    o_ref[0] = jnp.maximum(acc + b_ref[...], 0.0).astype(o_ref.dtype)


@functools.partial(jax.jit,
                   static_argnames=("ksize", "block_m", "compute_dtype"))
def conv_relu_forward(x_nchw, w_oihw, conv_bias, gamma, beta,
                      running_mean, running_var, *, ksize, eps=1e-5,
                      block_m=128, compute_dtype=jnp.float32):
    """Matches ConvReLU(inp, out, ksize).forward(x) in eval mode.

    x_nchw: (N, Cin, H, W) float32  ->  (N, Cout, H, W) float32
    """
    N, Cin, H, W = x_nchw.shape
    Cout = w_oihw.shape[0]
    assert ksize % 2 == 1, "only odd ksize ('same' padding) is supported"
    assert w_oihw.shape == (Cout, Cin, ksize, ksize)
    # stride=1, dilation=1, groups=1 are implied by the PyTorch module.
    pad = ksize // 2

    # ---------------- glue (plain JAX): layout, im2col, BN fold --------------
    x_nhwc = jnp.transpose(x_nchw, (0, 2, 3, 1))                      # NCHW->NHWC
    x_sp = jnp.pad(x_nhwc, ((0, 0), (pad, pad), (pad, pad), (0, 0)))

    # im2col: (N, H*W, K*K*Cin). Tap order (kh, kw, ci) matches the weight
    # reshape below.
    taps = [x_sp[:, kh:kh + H, kw:kw + W, :]
            for kh in range(ksize) for kw in range(ksize)]
    KKC = ksize * ksize * Cin
    x_cols = jnp.concatenate(taps, axis=-1).reshape(N, H * W, KKC)

    # Fold BN (eval mode) into weights / additive shift.
    inv_std = jax.lax.rsqrt(running_var + eps)
    scale = gamma * inv_std                                           # (Cout,)
    shift = beta + (conv_bias - running_mean) * scale                 # (Cout,)
    w_hwio = jnp.transpose(w_oihw, (2, 3, 1, 0))                      # (K,K,Cin,Cout)
    w_mat = (w_hwio * scale[None, None, None, :]).reshape(KKC, Cout)

    # Pad to lane/sublane-friendly shapes (contraction and Cout -> mult of 128,
    # spatial rows -> multiple of the row tile).
    M = H * W
    TM = block_m if M >= block_m else _round_up(M, 8)
    M_pad = _round_up(M, TM)
    KKC_pad = _round_up(KKC, 128)
    CO_pad = _round_up(Cout, 128)

    x_cols = jnp.pad(x_cols, ((0, 0), (0, M_pad - M), (0, KKC_pad - KKC)))
    w_mat = jnp.pad(w_mat, ((0, KKC_pad - KKC), (0, CO_pad - Cout)))
    shift_p = jnp.pad(shift.reshape(1, Cout), ((0, 0), (0, CO_pad - Cout)))

    x_cols = x_cols.astype(compute_dtype)      # bf16 recommended on v6e/v7x
    w_mat = w_mat.astype(compute_dtype)
    shift_p = shift_p.astype(jnp.float32)

    # ------------------------------ Pallas call ------------------------------
    grid = (N, M_pad // TM)
    out = pl.pallas_call(
        _conv_bn_relu_kernel,
        out_shape=jax.ShapeDtypeStruct((N, M_pad, CO_pad), jnp.float32),
        grid_spec=pltpu.PrefetchScalarGridSpec(
            num_scalar_prefetch=0,
            grid=grid,
            in_specs=[
                pl.BlockSpec((1, TM, KKC_pad), lambda n, m: (n, m, 0)),
                pl.BlockSpec((KKC_pad, CO_pad), lambda n, m: (0, 0)),
                pl.BlockSpec((1, CO_pad), lambda n, m: (0, 0)),
            ],
            out_specs=pl.BlockSpec((1, TM, CO_pad), lambda n, m: (n, m, 0)),
        ),
        compiler_params=pltpu.CompilerParams(
            dimension_semantics=("parallel", "parallel"),
            vmem_limit_bytes=32 * 1024 * 1024,
        ),
    )(x_cols, w_mat, shift_p)

    out = out[:, :M, :Cout].reshape(N, H, W, Cout)
    return jnp.transpose(out, (0, 3, 1, 2))                           # NHWC->NCHW


def _reference(x_nchw, w_oihw, conv_bias, gamma, beta,
               running_mean, running_var, ksize, eps=1e-5):
    """Pure-JAX reference (lax conv) for correctness checking."""
    pad = ksize // 2
    y = jax.lax.conv_general_dilated(
        x_nchw, w_oihw, window_strides=(1, 1),
        padding=((pad, pad), (pad, pad)),
        dimension_numbers=("NCHW", "OIHW", "NCHW"))
    y = y + conv_bias[None, :, None, None]
    inv_std = 1.0 / jnp.sqrt(running_var + eps)
    y = (y - running_mean[None, :, None, None]) \
        * (gamma * inv_std)[None, :, None, None] + beta[None, :, None, None]
    return jnp.maximum(y, 0.0)


if __name__ == "__main__":
    # Small shapes consistent with ConvReLU(inp=4, out=8, ksize=3).
    N, Cin, H, W = 2, 4, 16, 16
    Cout, ksize = 8, 3

    key = jax.random.PRNGKey(0)
    k_x, k_w, k_b, k_g, k_be, k_m, k_v = jax.random.split(key, 7)

    x = jax.random.normal(k_x, (N, Cin, H, W), dtype=jnp.float32)
    w = jax.random.normal(k_w, (Cout, Cin, ksize, ksize), dtype=jnp.float32) * 0.1
    conv_bias = jax.random.normal(k_b, (Cout,), dtype=jnp.float32) * 0.1
    gamma = 1.0 + 0.1 * jax.random.normal(k_g, (Cout,), dtype=jnp.float32)
    beta = 0.1 * jax.random.normal(k_be, (Cout,), dtype=jnp.float32)
    running_mean = 0.1 * jax.random.normal(k_m, (Cout,), dtype=jnp.float32)
    running_var = jnp.abs(jax.random.normal(k_v, (Cout,), dtype=jnp.float32)) + 0.5

    ref = _reference(x, w, conv_bias, gamma, beta, running_mean, running_var, ksize)

    # f32 operands (tight tolerance).
    out = conv_relu_forward(x, w, conv_bias, gamma, beta,
                            running_mean, running_var, ksize=ksize)
    out = jax.block_until_ready(out)
    assert out.shape == (N, Cout, H, W)
    assert jnp.allclose(out, ref, atol=1e-4, rtol=1e-4), \
        f"f32 max abs diff {jnp.max(jnp.abs(out - ref))}"

    # bf16 operands / f32 accumulation (recommended on v6e/v7x), loose tolerance.
    out_bf16 = conv_relu_forward(x, w, conv_bias, gamma, beta,
                                 running_mean, running_var, ksize=ksize,
                                 compute_dtype=jnp.bfloat16)
    out_bf16 = jax.block_until_ready(out_bf16)
    assert jnp.allclose(out_bf16, ref, atol=1e-1, rtol=1e-1), \
        f"bf16 max abs diff {jnp.max(jnp.abs(out_bf16 - ref))}"

    print("KERNEL_OK")
</pallas_src>

<mosaic_0001>
module attributes {stable_mosaic.version = 11 : i64} {
  func.func @_conv_bn_relu_kernel(%arg0: i32, %arg1: i32, %arg2: memref<1x128x128xf32, #tpu.memory_space<vmem>>, %arg3: memref<128x128xf32, #tpu.memory_space<vmem>>, %arg4: memref<1x128xf32, #tpu.memory_space<vmem>>, %arg5: memref<1x128x128xf32, #tpu.memory_space<vmem>>) attributes {dimension_semantics = [#tpu.dimension_semantics<parallel>, #tpu.dimension_semantics<parallel>], iteration_bounds = array<i64: 2, 2>, scalar_prefetch = 0 : i64, scratch_operands = 0 : i64, tpu.core_type = #tpu.core_type<tc>, window_params = [{transform_indices = @transform_0, window_bounds = array<i64: 1, 128, 128>}, {pipeline_mode = #tpu.pipeline_mode<synchronous>, transform_indices = @transform_1, window_bounds = array<i64: 128, 128>}, {pipeline_mode = #tpu.pipeline_mode<synchronous>, transform_indices = @transform_2, window_bounds = array<i64: 1, 128>}, {transform_indices = @transform_3, window_bounds = array<i64: 1, 128, 128>}]} {
    %c0 = arith.constant 0 : index
    %c0_0 = arith.constant 0 : index
    %c0_1 = arith.constant 0 : index
    %0 = vector.load %arg2[%c0, %c0_0, %c0_1] : memref<1x128x128xf32, #tpu.memory_space<vmem>>, vector<1x128x128xf32>
    %1 = vector.shape_cast %0 : vector<1x128x128xf32> to vector<128x128xf32>
    %c0_2 = arith.constant 0 : index
    %c0_3 = arith.constant 0 : index
    %2 = vector.load %arg3[%c0_2, %c0_3] : memref<128x128xf32, #tpu.memory_space<vmem>>, vector<128x128xf32>
    %cst = arith.constant dense<0.000000e+00> : vector<128x128xf32>
    %3 = tpu.matmul %1, %2, %cst {dimension_numbers = #tpu.dot_dimension_numbers<[1], [0], [0], [1], [0, 0, 1, 1], [], []>} : vector<128x128xf32>, vector<128x128xf32>, vector<128x128xf32> -> vector<128x128xf32>
    %c0_4 = arith.constant 0 : index
    %c0_5 = arith.constant 0 : index
    %4 = vector.load %arg4[%c0_4, %c0_5] : memref<1x128xf32, #tpu.memory_space<vmem>>, vector<1x128xf32>
    %5 = vector.broadcast %4 : vector<1x128xf32> to vector<128x128xf32>
    %6 = arith.addf %3, %5 : vector<128x128xf32>
    %cst_6 = arith.constant 0.000000e+00 : f32
    %7 = vector.broadcast %cst_6 : f32 to vector<128x128xf32>
    %8 = arith.maximumf %6, %7 : vector<128x128xf32>
    %c0_7 = arith.constant 0 : index
    %c0_8 = arith.constant 0 : index
    %c0_9 = arith.constant 0 : index
    %9 = vector.load %arg5[%c0_7, %c0_8, %c0_9] : memref<1x128x128xf32, #tpu.memory_space<vmem>>, vector<1x128x128xf32>
    %10 = vector.shape_cast %9 : vector<1x128x128xf32> to vector<128x128xf32>
    %11 = vector.shape_cast %8 : vector<128x128xf32> to vector<1x128x128xf32>
    tpu.vector_store %arg5[%c0_7, %c0_8, %c0_9], %11 {strides = array<i32>} : memref<1x128x128xf32, #tpu.memory_space<vmem>>, vector<1x128x128xf32>,
    return
  }
  func.func @transform_0(%arg0: i32, %arg1: i32) -> (i32, i32, i32) {
    %c0_i32 = arith.constant 0 : i32
    %c0_i32_0 = arith.constant 0 : i32
    return %arg0, %arg1, %c0_i32 : i32, i32, i32
  }
  func.func @transform_1(%arg0: i32, %arg1: i32) -> (i32, i32) {
    %c0_i32 = arith.constant 0 : i32
    %c0_i32_0 = arith.constant 0 : i32
    %c0_i32_1 = arith.constant 0 : i32
    return %c0_i32, %c0_i32_0 : i32, i32
  }
  func.func @transform_2(%arg0: i32, %arg1: i32) -> (i32, i32) {
    %c0_i32 = arith.constant 0 : i32
    %c0_i32_0 = arith.constant 0 : i32
    %c0_i32_1 = arith.constant 0 : i32
    return %c0_i32, %c0_i32_0 : i32, i32
  }
  func.func @transform_3(%arg0: i32, %arg1: i32) -> (i32, i32, i32) {
    %c0_i32 = arith.constant 0 : i32
    %c0_i32_0 = arith.constant 0 : i32
    return %arg0, %arg1, %c0_i32 : i32, i32, i32
  }
}

</mosaic_0001>

<bundles_post_ra>
// kernel: conv_relu_forward.1
= control target key start
LH: loop header
LB: loop body
LE: loop exit
PB: predicated region body
PF: predicated region fallthrough
CT: control target
= control target key end

     0   :  { %s750_s12 = smov 0   ;;  %s752_s13 = smov 0   ;;  %s902_s0 = inlined_call_operand.vmem [shape: f32[2,256,128], index: 0, kind: input, shape index: {}]   ;;  %s903_s1 = inlined_call_operand.vmem [shape: f32[128,128], index: 1, kind: input, shape index: {}]   ;;  %s904_s2 = inlined_call_operand.vmem [shape: f32[1,128], index: 2, kind: input, shape index: {}]   ;;  %s905_s3 = inlined_call_operand.vmem [shape: f32[2,256,128], index: 3, kind: output, shape index: {}]  }
   0x1   :  { %s754_s14 = smov 0   ;;  %s756_s15 = smov 0  }
   0x2   :  { %s758_s16 = smov 0  }
   0x3 LB: > { %s22_s17 = sadd.s32 1, %s720_s14  ;;  %s25_s18 = sadd.s32 1, %s724_s15  ;;  %s728_s16 = sphi %s758_s16, %s13_s16   ;;  %s724_s15 = sphi %s756_s15, %s909_s15   ;;  %s720_s14 = sphi %s754_s14, %s908_s14   ;;  %s716_s13 = sphi %s752_s13, %s907_s13   ;;  %s712_s12 = sphi %s750_s12, %s906_s12  }
   0x4   : > { %p23_p0 = scmp.ge.s32.totalorder %s22_s17, 2  ;;  %p520_p1 = scmp.ge.s32.totalorder %s728_s16, 1 }
   0x5   : > { %p158_p2 = scmp.lt.s32.totalorder %s728_s16, 5 }
   0x6   : > { %s911_s17 = smov (%p23_p0, %s22_s17), 0  ;;  %s913_s18 = smov (!%p23_p0, %s25_s18), %s724_s15 }
   0x7   : > { %p159_p3 = pnand %p520_p1, %p158_p2  ;;  %p27_p4 = scmp.ge.s32.totalorder %s913_s18, 2 }
   0x8   : > { %s521_s6 = sshll.u32 (!%p159_p3), %s712_s12, 4  ;;  %p191_p5 = scmp.lt.s32.totalorder (!%p159_p3), %s716_s13, 1 }
   0x9   : > { %s915_s18 = smov (%p27_p4, %s913_s18), 0  ;;  %162 = sbr.rel (%p159_p3) target bundleno = 260 (0x104), region = 32 }
   0xa   : > { %p193_p6 = scmp.lt.s32.totalorder (!%p159_p3), %s521_s6, 31 }
   0xe   : > { %v241_v0 = vld [vmem:[%s903_s1 + $0x78] sm:$0xff]  ;;  %v240_v1 = vld [vmem:[%s903_s1 + $0x70] sm:$0xff]  ;;  %v239_v2 = vld [vmem:[%s903_s1 + $0x68] sm:$0xff]  ;;  %s917_s13 = smov (!%p191_p5, %s716_s13), 1  ;;  %s919_s6 = smov (!%p193_p6, %s521_s6), 31 }
   0xf   : > { %562 = vmatprep.subr.mxu0 %v241_v0  ;;  %618 = vmatprep.subr.mxu1 %v241_v0  ;;  %v238_v3 = vld [vmem:[%s903_s1 + $0x60] sm:$0xff]  ;;  %v237_v4 = vld [vmem:[%s903_s1 + $0x58] sm:$0xff]  ;;  %v236_v5 = vld [vmem:[%s903_s1 + $0x50] sm:$0xff]  ;;  %s522_s21 = sshll.u32 %s917_s13, 5 }
  0x10   : > { %563 = vmatpush3.msra.mxu0 %v241_v0  ;;  %634 = vmatpush3.msra.mxu1 %v241_v0  ;;  %v235_v6 = vld [vmem:[%s903_s1 + $0x48] sm:$0xff]  ;;  %v234_v7 = vld [vmem:[%s903_s1 + $0x40] sm:$0xff]  ;;  %v233_v8 = vld [vmem:[%s903_s1 + $0x38] sm:$0xff]  ;;  %s823_s24 = sadd.s32 %s522_s21, %s919_s6 }
  0x11   : > { %564 = vmatprep.subr.mxu0 %v240_v1  ;;  %619 = vmatprep.subr.mxu1 %v240_v1  ;;  %v232_v9 = vld [vmem:[%s903_s1 + $0x30] sm:$0xff]  ;;  %v231_v10 = vld [vmem:[%s903_s1 + $0x28] sm:$0xff]  ;;  %v230_v11 = vld [vmem:[%s903_s1 + $0x20] sm:$0xff]  ;;  %s523_s28 = sshll.u32 %s823_s24, 3 }
  0x12   : > { %565 = vmatpush3.msra.mxu0 %v240_v1  ;;  %635 = vmatpush3.msra.mxu1 %v240_v1  ;;  %v229_v12 = vld [vmem:[%s903_s1 + $0x18] sm:$0xff]  ;;  %v228_v13 = vld [vmem:[%s903_s1 + $0x10] sm:$0xff]  ;;  %v227_v14 = vld [vmem:[%s903_s1 + $0x8] sm:$0xff]  ;;  %s840_s6 = scalar_lea.vmem %s902_s0, %s523_s28  ;;  %s869_s19 = scalar_lea.vmem %s905_s3, %s523_s28 }
  0x13   : > { %566 = vmatprep.subr.mxu0 %v239_v2  ;;  %620 = vmatprep.subr.mxu1 %v239_v2  ;;  %v226_v15 = vld [vmem:[%s903_s1] sm:$0xff]  ;;  %v211_v18 = vld [vmem:[%s840_s6 + $0x8] sm:$0xff]  ;;  %v212_v20 = vld [vmem:[%s840_s6 + $0x10] sm:$0xff] }
  0x14   : > { %567 = vmatpush3.msra.mxu0 %v239_v2  ;;  %636 = vmatpush3.msra.mxu1 %v239_v2  ;;  %v210_v16 = vld [vmem:[%s840_s6] sm:$0xff]  ;;  %v219_v19 = vld [vmem:[%s840_s6 + $0x48] sm:$0xff]  ;;  %v220_v21 = vld [vmem:[%s840_s6 + $0x50] sm:$0xff] }
  0x15   : > { %568 = vmatprep.subr.mxu0 %v238_v3  ;;  %621 = vmatprep.subr.mxu1 %v238_v3  ;;  %v218_v17 = vld [vmem:[%s840_s6 + $0x40] sm:$0xff]  ;;  %v213_v22 = vld [vmem:[%s840_s6 + $0x18] sm:$0xff]  ;;  %v215_v26 = vld [vmem:[%s840_s6 + $0x28] sm:$0xff] }
  0x16   : > { %569 = vmatpush3.msra.mxu0 %v238_v3  ;;  %637 = vmatpush3.msra.mxu1 %v238_v3  ;;  %v221_v23 = vld [vmem:[%s840_s6 + $0x58] sm:$0xff]  ;;  %v214_v24 = vld [vmem:[%s840_s6 + $0x20] sm:$0xff]  ;;  %v223_v27 = vld [vmem:[%s840_s6 + $0x68] sm:$0xff] }
  0x17   : > { %570 = vmatprep.subr.mxu0 %v237_v4  ;;  %622 = vmatprep.subr.mxu1 %v237_v4  ;;  %v222_v25 = vld [vmem:[%s840_s6 + $0x60] sm:$0xff]  ;;  %v216_v28 = vld [vmem:[%s840_s6 + $0x30] sm:$0xff]  ;;  %v217_v30 = vld [vmem:[%s840_s6 + $0x38] sm:$0xff] }
  0x18   : > { %571 = vmatpush3.msra.mxu0 %v237_v4  ;;  %638 = vmatpush3.msra.mxu1 %v237_v4  ;;  %v224_v29 = vld [vmem:[%s840_s6 + $0x70] sm:$0xff]  ;;  %v225_v31 = vld [vmem:[%s840_s6 + $0x78] sm:$0xff]  ;;  %v527_v32 = vld [vmem:[%s904_s2] ss:$0 sm:$0xff] }
  0x19   : > { %572 = vmatprep.subr.mxu0 %v236_v5  ;;  %623 = vmatprep.subr.mxu1 %v236_v5 }
  0x1a   : > { %573 = vmatpush3.msra.mxu0 %v236_v5  ;;  %639 = vmatpush3.msra.mxu1 %v236_v5 }
  0x1b   : > { %574 = vmatprep.subr.mxu0 %v235_v6  ;;  %624 = vmatprep.subr.mxu1 %v235_v6 }
  0x1c   : > { %575 = vmatpush3.msra.mxu0 %v235_v6  ;;  %640 = vmatpush3.msra.mxu1 %v235_v6 }
  0x1d   : > { %576 = vmatprep.subr.mxu0 %v234_v7  ;;  %625 = vmatprep.subr.mxu1 %v234_v7 }
  0x1e   : > { %577 = vmatpush3.msra.mxu0 %v234_v7  ;;  %641 = vmatpush3.msra.mxu1 %v234_v7 }
  0x1f   : > { %578 = vmatprep.subr.mxu0 %v233_v8  ;;  %626 = vmatprep.subr.mxu1 %v233_v8 }
  0x20   : > { %579 = vmatpush3.msra.mxu0 %v233_v8  ;;  %642 = vmatpush3.msra.mxu1 %v233_v8 }
  0x21   : > { %580 = vmatprep.subr.mxu0 %v232_v9  ;;  %627 = vmatprep.subr.mxu1 %v232_v9 }
  0x22   : > { %581 = vmatpush3.msra.mxu0 %v232_v9  ;;  %643 = vmatpush3.msra.mxu1 %v232_v9 }
  0x23   : > { %582 = vmatprep.subr.mxu0 %v231_v10  ;;  %628 = vmatprep.subr.mxu1 %v231_v10 }
  0x24   : > { %583 = vmatpush3.msra.mxu0 %v231_v10  ;;  %644 = vmatpush3.msra.mxu1 %v231_v10 }
  0x25   : > { %584 = vmatprep.subr.mxu0 %v230_v11  ;;  %629 = vmatprep.subr.mxu1 %v230_v11 }
  0x26   : > { %585 = vmatpush3.msra.mxu0 %v230_v11  ;;  %645 = vmatpush3.msra.mxu1 %v230_v11 }
  0x27   : > { %586 = vmatprep.subr.mxu0 %v229_v12  ;;  %630 = vmatprep.subr.mxu1 %v229_v12 }
  0x28   : > { %587 = vmatpush3.msra.mxu0 %v229_v12  ;;  %646 = vmatpush3.msra.mxu1 %v229_v12 }
  0x29   : > { %588 = vmatprep.subr.mxu0 %v228_v13  ;;  %631 = vmatprep.subr.mxu1 %v228_v13 }
  0x2a   : > { %589 = vmatpush3.msra.mxu0 %v228_v13  ;;  %647 = vmatpush3.msra.mxu1 %v228_v13 }
  0x2b   : > { %590 = vmatprep.subr.mxu0 %v227_v14  ;;  %632 = vmatprep.subr.mxu1 %v227_v14 }
  0x2c   : > { %591 = vmatpush3.msra.mxu0 %v227_v14  ;;  %648 = vmatpush3.msra.mxu1 %v227_v14 }
  0x2d   : > { %592 = vmatprep.subr.mxu0 %v226_v15  ;;  %633 = vmatprep.subr.mxu1 %v226_v15 }
  0x2e   : > { %593 = vmatpush3.msra.mxu0 %v226_v15  ;;  %649 = vmatpush3.msra.mxu1 %v226_v15 }
  0x2f   : > { %594 = vmatprep.mubr.f32.mxu0 %v210_v16  ;;  %606 = vmatprep.mubr.f32.mxu1 %v218_v17 }
  0x30   : > { %595 = vmatmul.mubr.f32.vlgmr.msra.gmra.mxu0 %v211_v18  ;;  %607 = vmatmul.mubr.f32.vlgmr.msra.gmra.mxu1 %v219_v19 }
  0x31   : > { %597 = vmatprep.mubr.f32.mxu0 %v212_v20  ;;  %609 = vmatprep.mubr.f32.mxu1 %v220_v21 }
  0x34   : > { %598 = vmatmul.mubr.f32.gmra.mxu0 %v213_v22  ;;  %610 = vmatmul.mubr.f32.gmra.mxu1 %v221_v23 }
  0x35   : > { %600 = vmatprep.mubr.f32.mxu0 %v214_v24  ;;  %612 = vmatprep.mubr.f32.mxu1 %v222_v25 }
  0x38   : > { %601 = vmatmul.mubr.f32.gmra.mxu0 %v215_v26  ;;  %613 = vmatmul.mubr.f32.gmra.mxu1 %v223_v27 }
  0x39   : > { %603 = vmatprep.mubr.f32.mxu0 %v216_v28  ;;  %615 = vmatprep.mubr.f32.mxu1 %v224_v29 }
  0x3c   : > { %604 = vmatmul.mubr.f32.gmra.mxu0 %v217_v30  ;;  %616 = vmatmul.mubr.f32.gmra.mxu1 %v225_v31 }
  0xf0   : > { %v596_v33 = vpop.f32.mrf.mxu0  ;;  %v608_v34 = vpop.f32.mrf.mxu1 }
  0xf1   : > { %v321_v35 = vadd.f32 %v596_v33, %v527_v32  ;;  %v361_v36 = vadd.f32 %v608_v34, %v527_v32 }
  0xf2   : > { %v315_v37 = vpop.f32.mrf.mxu0  ;;  %v355_v38 = vpop.f32.mrf.mxu1 }
  0xf3   : > { %v395_v39 = vmax.f32 %v321_v35, 0.0  ;;  %v403_v40 = vmax.f32 %v361_v36, 0.0  ;;  %v316_v41 = vadd.f32 %v527_v32, %v315_v37  ;;  %v356_v42 = vadd.f32 %v527_v32, %v355_v38 }
  0xf4   : > { %v599_v43 = vpop.f32.mrf.mxu0  ;;  %v611_v44 = vpop.f32.mrf.mxu1 }
  0xf5   : > { %411 = vst [vmem:[%s869_s19 + $0x8] sm:$0xff] %v395_v39  ;;  %419 = vst [vmem:[%s869_s19 + $0x48] sm:$0xff] %v403_v40  ;;  %v394_v45 = vmax.f32 %v316_v41, 0.0  ;;  %v402_v46 = vmax.f32 %v356_v42, 0.0  ;;  %v331_v47 = vadd.f32 %v599_v43, %v527_v32  ;;  %v371_v48 = vadd.f32 %v611_v44, %v527_v32 }
  0xf6   : > { %v325_v49 = vpop.f32.mrf.mxu0  ;;  %v365_v50 = vpop.f32.mrf.mxu1 }
  0xf7   : > { %410 = vst [vmem:[%s869_s19] sm:$0xff] %v394_v45  ;;  %418 = vst [vmem:[%s869_s19 + $0x40] sm:$0xff] %v402_v46  ;;  %v397_v51 = vmax.f32 %v331_v47, 0.0  ;;  %v405_v52 = vmax.f32 %v371_v48, 0.0  ;;  %v326_v53 = vadd.f32 %v527_v32, %v325_v49  ;;  %v366_v54 = vadd.f32 %v527_v32, %v365_v50 }
  0xf8   : > { %v602_v55 = vpop.f32.mrf.mxu0  ;;  %v614_v56 = vpop.f32.mrf.mxu1 }
  0xf9   : > { %413 = vst [vmem:[%s869_s19 + $0x18] sm:$0xff] %v397_v51  ;;  %421 = vst [vmem:[%s869_s19 + $0x58] sm:$0xff] %v405_v52  ;;  %v396_v57 = vmax.f32 %v326_v53, 0.0  ;;  %v404_v58 = vmax.f32 %v366_v54, 0.0  ;;  %v341_v59 = vadd.f32 %v602_v55, %v527_v32  ;;  %v381_v60 = vadd.f32 %v614_v56, %v527_v32 }
  0xfa   : > { %v335_v61 = vpop.f32.mrf.mxu0  ;;  %v375_v62 = vpop.f32.mrf.mxu1 }
  0xfb   : > { %412 = vst [vmem:[%s869_s19 + $0x10] sm:$0xff] %v396_v57  ;;  %420 = vst [vmem:[%s869_s19 + $0x50] sm:$0xff] %v404_v58  ;;  %v399_v63 = vmax.f32 %v341_v59, 0.0  ;;  %v407_v0 = vmax.f32 %v381_v60, 0.0  ;;  %v336_v1 = vadd.f32 %v527_v32, %v335_v61  ;;  %v376_v2 = vadd.f32 %v527_v32, %v375_v62 }
  0xfc   : > { %v605_v3 = vpop.f32.mrf.mxu0  ;;  %v617_v4 = vpop.f32.mrf.mxu1 }
  0xfd   : > { %415 = vst [vmem:[%s869_s19 + $0x28] sm:$0xff] %v399_v63  ;;  %423 = vst [vmem:[%s869_s19 + $0x68] sm:$0xff] %v407_v0  ;;  %v398_v5 = vmax.f32 %v336_v1, 0.0  ;;  %v406_v6 = vmax.f32 %v376_v2, 0.0  ;;  %v351_v7 = vadd.f32 %v605_v3, %v527_v32  ;;  %v391_v8 = vadd.f32 %v617_v4, %v527_v32 }
  0xfe   : > { %v345_v9 = vpop.f32.mrf.mxu0  ;;  %v385_v10 = vpop.f32.mrf.mxu1 }
  0xff   : > { %414 = vst [vmem:[%s869_s19 + $0x20] sm:$0xff] %v398_v5  ;;  %422 = vst [vmem:[%s869_s19 + $0x60] sm:$0xff] %v406_v6  ;;  %v401_v11 = vmax.f32 %v351_v7, 0.0  ;;  %v409_v12 = vmax.f32 %v391_v8, 0.0  ;;  %v346_v13 = vadd.f32 %v527_v32, %v345_v9  ;;  %v386_v14 = vadd.f32 %v527_v32, %v385_v10 }
 0x101   : > { %417 = vst [vmem:[%s869_s19 + $0x38] sm:$0xff] %v401_v11  ;;  %425 = vst [vmem:[%s869_s19 + $0x78] sm:$0xff] %v409_v12  ;;  %v400_v15 = vmax.f32 %v346_v13, 0.0  ;;  %v408_v16 = vmax.f32 %v386_v14, 0.0 }
 0x103   : > { %416 = vst [vmem:[%s869_s19 + $0x30] sm:$0xff] %v400_v15  ;;  %424 = vst [vmem:[%s869_s19 + $0x70] sm:$0xff] %v408_v16 }
 0x104 PF: > { %s13_s16 = sadd.s32 1, %s728_s16   ;;  %s906_s12 = smov %s720_s14 }
 0x105   : > { %p10_p7 = scmp.ge.s32.totalorder %s13_s16, 6   ;;  %s907_s13 = smov %s724_s15 }
 0x106   : > { %s908_s14 = smov %s911_s17  ;;  %s909_s15 = smov %s915_s18 }
 0x107   :  { %12 = sbr.rel (!%p10_p7) target bundleno = 3 (0x3), region = 62 }

</bundles_post_ra>
